<compile_context>
chip_gen: v6e
topology: v6e:2x2x1
jax: 0.10.0
libtpu: 0.0.40
codegen_flags: <defaults>
</compile_context>

<pallas_src>
import functools

import jax
import jax.numpy as jnp
from jax.experimental import pallas as pl
from jax.experimental.pallas import tpu as pltpu


_ACTIVATIONS = {
    "tanh": jnp.tanh,
    "relu": lambda y: jnp.maximum(y, 0.0),
    "sigmoid": jax.nn.sigmoid,
}


def _round_up(x, m):
    return ((x + m - 1) // m) * m


def _fused_mlp_kernel(x_ref, *refs, n_layers, activation):
    """refs = (w0, b0, w1, b1, ..., o_ref). All layers computed in-VMEM."""
    o_ref = refs[-1]
    wb_refs = refs[:-1]
    act = _ACTIVATIONS[activation]

    # bf16 operands for the MXU; accumulate in f32.
    h = x_ref[...].astype(jnp.bfloat16)
    for layer in range(n_layers):
        w = wb_refs[2 * layer][...]            # (K_l, N_l) bf16
        b = wb_refs[2 * layer + 1][...]        # (1, N_l)  f32 — broadcasts over rows
        y = jnp.dot(h, w, preferred_element_type=jnp.float32) + b
        y = act(y)                             # epilogue stays f32 (v5e-safe)
        if layer + 1 < n_layers:
            h = y.astype(jnp.bfloat16)         # feed next MXU layer in bf16
        else:
            o_ref[...] = y.astype(o_ref.dtype)


def mlp_forward(x, params, activation="tanh", *, block_m=256):
    """Fused MLP forward: activation(...activation(x @ W0 + b0)... @ Wn + bn)."""
    if activation not in _ACTIVATIONS:
        raise ValueError(f"unknown activation {activation!r}")
    B, K0 = x.shape
    n_layers = len(params)
    n_out = params[-1][0].shape[1]

    # --- batch tiling (tm multiple of 8 for clean sublane layout) -----------
    block_m = max(8, _round_up(block_m, 8))
    tm = min(block_m, _round_up(B, 8))
    b_pad = _round_up(B, tm)
    x_in = x if b_pad == B else jnp.pad(x, ((0, b_pad - B), (0, 0)))
    grid = (b_pad // tm,)

    # --- specs --------------------------------------------------------------
    in_specs = [pl.BlockSpec((tm, K0), lambda i: (i, 0))]
    flat_args = []
    k = K0
    for w, b in params:
        assert w.shape[0] == k and b.shape == (w.shape[1],)
        n = w.shape[1]
        in_specs.append(pl.BlockSpec((k, n), lambda i: (0, 0)))   # weight: resident
        in_specs.append(pl.BlockSpec((1, n), lambda i: (0, 0)))   # bias:   resident
        flat_args.append(w.astype(jnp.bfloat16))
        flat_args.append(b.reshape(1, n).astype(jnp.float32))
        k = n
    out_spec = pl.BlockSpec((tm, n_out), lambda i: (i, 0))

    # --- VMEM budget: double-buffered x/out tiles + resident weights --------
    itemsize = x.dtype.itemsize
    block_bytes = 2 * (tm * K0 * itemsize + tm * n_out * itemsize)  # dbl-buffered
    for w, b in params:
        block_bytes += w.size * 2 + b.size * 4                      # bf16 W, f32 b
    vmem_limit = min(64 << 20, max(16 << 20, 2 * block_bytes + (4 << 20)))

    kernel = functools.partial(
        _fused_mlp_kernel, n_layers=n_layers, activation=activation
    )

    out = pl.pallas_call(
        kernel,
        out_shape=jax.ShapeDtypeStruct((b_pad, n_out), x.dtype),
        grid_spec=pltpu.PrefetchScalarGridSpec(
            num_scalar_prefetch=0,
            grid=grid,
            in_specs=in_specs,
            out_specs=out_spec,
        ),
        compiler_params=pltpu.CompilerParams(
            dimension_semantics=("parallel",),
            vmem_limit_bytes=int(vmem_limit),
        ),
    )(x_in, *flat_args)

    return out if b_pad == B else out[:B]


class MLP:
    """JAX/Pallas port of the PyTorch MLP module (bf16 weights, f32 biases)."""

    def __init__(self, input_dim, hidden_dims=(128, 128), activation="tanh",
                 key=None):
        if key is None:
            key = jax.random.PRNGKey(0)
        self.activation = activation
        self.out_dim = hidden_dims[-1]
        self.params = []
        last_dim = input_dim
        for nh in hidden_dims:
            key, kw, kb = jax.random.split(key, 3)
            # PyTorch nn.Linear default init: U(-1/sqrt(in), 1/sqrt(in))
            bound = 1.0 / (last_dim ** 0.5)
            w = jax.random.uniform(kw, (last_dim, nh), jnp.float32,
                                   minval=-bound, maxval=bound)
            b = jax.random.uniform(kb, (nh,), jnp.float32,
                                   minval=-bound, maxval=bound)
            self.params.append((w.astype(jnp.bfloat16), b))
            last_dim = nh

    def __call__(self, x, *, block_m=256):
        return mlp_forward(x, self.params, self.activation, block_m=block_m)


def mlp_reference(x, params, activation="tanh"):
    """Pure-JAX reference mirroring the kernel's bf16-operand / f32-accum math."""
    act = _ACTIVATIONS[activation]
    h = x
    for w, b in params:
        y = jnp.dot(h.astype(jnp.bfloat16), w.astype(jnp.bfloat16),
                    preferred_element_type=jnp.float32) + b.astype(jnp.float32)
        h = act(y)
    return h.astype(x.dtype)


if __name__ == "__main__":
    key = jax.random.PRNGKey(0)
    batch, input_dim = 8, 32
    hidden_dims = (128, 128)

    model = MLP(input_dim, hidden_dims=hidden_dims, activation="tanh",
                key=jax.random.PRNGKey(42))

    # --- small shape consistent with the module -----------------------------
    x = jax.random.normal(key, (batch, input_dim), jnp.float32)
    out = jax.block_until_ready(model(x))
    ref = mlp_reference(x, model.params, "tanh")
    assert out.shape == (batch, hidden_dims[-1])
    assert jnp.allclose(out, ref, atol=1e-4, rtol=1e-4), "mismatch vs reference"

    # --- exercise the tiled / padded batch path ------------------------------
    x2 = jax.random.normal(jax.random.PRNGKey(1), (300, input_dim), jnp.float32)
    out2 = jax.block_until_ready(model(x2, block_m=128))
    ref2 = mlp_reference(x2, model.params, "tanh")
    assert out2.shape == (300, hidden_dims[-1])
    assert jnp.allclose(out2, ref2, atol=1e-4, rtol=1e-4), "tiled mismatch"

    print("KERNEL_OK")
</pallas_src>

<mosaic_0001>
module attributes {stable_mosaic.version = 11 : i64} {
  func.func @_fused_mlp_kernel(%arg0: i32, %arg1: memref<8x32xf32, #tpu.memory_space<vmem>>, %arg2: memref<32x128xbf16, #tpu.memory_space<vmem>>, %arg3: memref<1x128xf32, #tpu.memory_space<vmem>>, %arg4: memref<128x128xbf16, #tpu.memory_space<vmem>>, %arg5: memref<1x128xf32, #tpu.memory_space<vmem>>, %arg6: memref<8x128xf32, #tpu.memory_space<vmem>>) attributes {dimension_semantics = [#tpu.dimension_semantics<parallel>], iteration_bounds = array<i64: 1>, scalar_prefetch = 0 : i64, scratch_operands = 0 : i64, tpu.core_type = #tpu.core_type<tc>, window_params = [{transform_indices = @transform_0, window_bounds = array<i64: 8, 32>}, {pipeline_mode = #tpu.pipeline_mode<synchronous>, transform_indices = @transform_1, window_bounds = array<i64: 32, 128>}, {pipeline_mode = #tpu.pipeline_mode<synchronous>, transform_indices = @transform_2, window_bounds = array<i64: 1, 128>}, {pipeline_mode = #tpu.pipeline_mode<synchronous>, transform_indices = @transform_3, window_bounds = array<i64: 128, 128>}, {pipeline_mode = #tpu.pipeline_mode<synchronous>, transform_indices = @transform_4, window_bounds = array<i64: 1, 128>}, {transform_indices = @transform_5, window_bounds = array<i64: 8, 128>}]} {
    %c0 = arith.constant 0 : index
    %c0_0 = arith.constant 0 : index
    %0 = vector.load %arg1[%c0, %c0_0] : memref<8x32xf32, #tpu.memory_space<vmem>>, vector<8x32xf32>
    %1 = arith.truncf %0 : vector<8x32xf32> to vector<8x32xbf16>
    %c0_1 = arith.constant 0 : index
    %c0_2 = arith.constant 0 : index
    %2 = vector.load %arg2[%c0_1, %c0_2] : memref<32x128xbf16, #tpu.memory_space<vmem>>, vector<32x128xbf16>
    %c0_3 = arith.constant 0 : index
    %c0_4 = arith.constant 0 : index
    %3 = vector.load %arg3[%c0_3, %c0_4] : memref<1x128xf32, #tpu.memory_space<vmem>>, vector<1x128xf32>
    %cst = arith.constant dense<0.000000e+00> : vector<8x128xf32>
    %4 = tpu.matmul %1, %2, %cst {dimension_numbers = #tpu.dot_dimension_numbers<[1], [0], [0], [1], [0, 0, 1, 1], [], []>} : vector<8x32xbf16>, vector<32x128xbf16>, vector<8x128xf32> -> vector<8x128xf32>
    %5 = vector.broadcast %3 : vector<1x128xf32> to vector<8x128xf32>
    %6 = arith.addf %4, %5 : vector<8x128xf32>
    %7 = math.tanh %6 : vector<8x128xf32>
    %8 = arith.truncf %7 : vector<8x128xf32> to vector<8x128xbf16>
    %c0_5 = arith.constant 0 : index
    %c0_6 = arith.constant 0 : index
    %9 = vector.load %arg4[%c0_5, %c0_6] : memref<128x128xbf16, #tpu.memory_space<vmem>>, vector<128x128xbf16>
    %c0_7 = arith.constant 0 : index
    %c0_8 = arith.constant 0 : index
    %10 = vector.load %arg5[%c0_7, %c0_8] : memref<1x128xf32, #tpu.memory_space<vmem>>, vector<1x128xf32>
    %cst_9 = arith.constant dense<0.000000e+00> : vector<8x128xf32>
    %11 = tpu.matmul %8, %9, %cst_9 {dimension_numbers = #tpu.dot_dimension_numbers<[1], [0], [0], [1], [0, 0, 1, 1], [], []>} : vector<8x128xbf16>, vector<128x128xbf16>, vector<8x128xf32> -> vector<8x128xf32>
    %12 = vector.broadcast %10 : vector<1x128xf32> to vector<8x128xf32>
    %13 = arith.addf %11, %12 : vector<8x128xf32>
    %14 = math.tanh %13 : vector<8x128xf32>
    %c0_10 = arith.constant 0 : index
    %c0_11 = arith.constant 0 : index
    %15 = vector.load %arg6[%c0_10, %c0_11] : memref<8x128xf32, #tpu.memory_space<vmem>>, vector<8x128xf32>
    tpu.vector_store %arg6[%c0_10, %c0_11], %14 {strides = array<i32>} : memref<8x128xf32, #tpu.memory_space<vmem>>, vector<8x128xf32>,
    return
  }
  func.func @transform_0(%arg0: i32) -> (i32, i32) {
    %c0_i32 = arith.constant 0 : i32
    %c0_i32_0 = arith.constant 0 : i32
    return %arg0, %c0_i32 : i32, i32
  }
  func.func @transform_1(%arg0: i32) -> (i32, i32) {
    %c0_i32 = arith.constant 0 : i32
    %c0_i32_0 = arith.constant 0 : i32
    %c0_i32_1 = arith.constant 0 : i32
    return %c0_i32, %c0_i32_0 : i32, i32
  }
  func.func @transform_2(%arg0: i32) -> (i32, i32) {
    %c0_i32 = arith.constant 0 : i32
    %c0_i32_0 = arith.constant 0 : i32
    %c0_i32_1 = arith.constant 0 : i32
    return %c0_i32, %c0_i32_0 : i32, i32
  }
  func.func @transform_3(%arg0: i32) -> (i32, i32) {
    %c0_i32 = arith.constant 0 : i32
    %c0_i32_0 = arith.constant 0 : i32
    %c0_i32_1 = arith.constant 0 : i32
    return %c0_i32, %c0_i32_0 : i32, i32
  }
  func.func @transform_4(%arg0: i32) -> (i32, i32) {
    %c0_i32 = arith.constant 0 : i32
    %c0_i32_0 = arith.constant 0 : i32
    %c0_i32_1 = arith.constant 0 : i32
    return %c0_i32, %c0_i32_0 : i32, i32
  }
  func.func @transform_5(%arg0: i32) -> (i32, i32) {
    %c0_i32 = arith.constant 0 : i32
    %c0_i32_0 = arith.constant 0 : i32
    return %arg0, %c0_i32 : i32, i32
  }
}

</mosaic_0001>

<bundles_post_ra>
// kernel: tpu_custom_call.1
= control target key start
LH: loop header
LB: loop body
LE: loop exit
PB: predicated region body
PF: predicated region fallthrough
CT: control target
= control target key end

     0   :  { %10 = vsyncpa [#allocation3], 0  ;;  %s478_s0 = inlined_call_operand.hbm [shape: f32[8,32], index: 0, kind: input, shape index: {}]   ;;  %s479_s1 = inlined_call_operand.hbm [shape: bf16[32,128], index: 1, kind: input, shape index: {}]   ;;  %s480_s2 = inlined_call_operand.vmem [shape: f32[1,128], index: 2, kind: input, shape index: {}]   ;;  %s481_s3 = inlined_call_operand.hbm [shape: bf16[128,128], index: 3, kind: input, shape index: {}]   ;;  %s482_s4 = inlined_call_operand.vmem [shape: f32[1,128], index: 4, kind: input, shape index: {}]   ;;  %s483_s5 = inlined_call_operand.hbm [shape: f32[8,128], index: 5, kind: output, shape index: {}]  }
   0x1   :  { %11 = vsyncpa [#allocation6], 0 }
   0x2   :  { %12 = vsyncpa [#allocation4], 0  ;;  %s422_s18 = smov [#allocation5]  }
   0x3   :  { %s28_s19 = sshll.u32 %s422_s18, 4  ;;  %s29_s19 = int_to_ptr.vmem [resolvable:$true] %s28_s19 }
   0x4   :  { %s344_s20 = scalar_lea.vmem %s29_s19, 256  ;;  %p349_p1 = scmp.lt.s32.totalorder %s29_s19, %s29_s19 }
   0x5   :  { %p345_p0 = scmp.ne.s32.totalorder %s29_s19, %s344_s20  ;;  %p350_p2 = scmp.lt.s32.totalorder %s344_s20, %s344_s20 }
   0x7   :  { %p351_p3 = por %p350_p2, %p349_p1 }
   0x9   :  { %p352_p4 = pnand %p351_p3, %p345_p0 }
   0xb   :  { %355 = shalt.err (!%p352_p4)
}
   0xc   :  { %s423_s21 = smov 64   ;;  %s424_s22 = smov 4  }
   0xd   :  { %34 = dma.hbm_to_vmem [thread:$0]  %s479_s1, 256, %s29_s19, [#allocation6], %s423_s21, %s423_s21, %s424_s22  }
   0xe   :  { %s425_s25 = smov [#allocation2]   ;;  %s426_s27 = smov [#allocation7]  }
   0xf   :  { %s19_s26 = sshll.u32 %s425_s25, 4  ;;  %s42_s28 = sshll.u32 %s426_s27, 4  ;;  %s20_s26 = int_to_ptr.vmem [resolvable:$true] %s19_s26  ;;  %s43_s28 = int_to_ptr.vmem [resolvable:$true] %s42_s28 }
  0x10   :  { %s364_s29 = scalar_lea.vmem %s20_s26, 128  ;;  %p369_p6 = scmp.lt.s32.totalorder %s20_s26, %s20_s26 }
  0x11   :  { %p365_p5 = scmp.ne.s32.totalorder %s20_s26, %s364_s29  ;;  %p370_p7 = scmp.lt.s32.totalorder %s364_s29, %s364_s29 }
  0x13   :  { %p371_p8 = por %p370_p7, %p369_p6 }
  0x15   :  { %p372_p9 = pnand %p371_p8, %p365_p5 }
  0x17   :  { %375 = shalt.err (!%p372_p9)
}
  0x18   :  { %22 = dma.hbm_to_vmem [thread:$0]  %s478_s0, 128, %s20_s26, [#allocation3]  }
  0x19   :  { %s384_s7 = scalar_lea.vmem %s43_s28, 1024  ;;  %p389_p11 = scmp.lt.s32.totalorder %s43_s28, %s43_s28 }
  0x1a   :  { %p385_p10 = scmp.ne.s32.totalorder %s43_s28, %s384_s7  ;;  %p390_p12 = scmp.lt.s32.totalorder %s384_s7, %s384_s7 }
  0x1c   :  { %p391_p13 = por %p390_p12, %p389_p11 }
  0x1e   :  { %p392_p0 = pnand %p391_p13, %p385_p10 }
  0x20   :  { %395 = shalt.err (!%p392_p0)
}
  0x21   :  { %48 = dma.hbm_to_vmem [thread:$0]  %s481_s3, 1024, %s43_s28, [#allocation6], %s423_s21, %s423_s21, %s424_s22  }
  0x22   :  { %416 = dma.done.wait [#allocation3], 128  }
  0x23   :  { %417 = vsyncadd [#allocation3], 4294967168 }
  0x24   :  { %418 = dma.done.wait [#allocation6], 1280  }
  0x25   :  { %419 = vsyncadd [#allocation6], 4294966016  ;;  %v427_v0 = vmov 0.0   ;;  %vm428_vm0 = vmmov 0   ;;  %v322_v1 = vld [vmem:[#allocation5 + $0x8] sm:$0xff]   ;;  %v323_v2 = vld [vmem:[#allocation5] sm:$0xff]  }
  0x26   :  { %286 = vmatprep.subr.bf16.mxu0 %v427_v0  ;;  %290 = vmatprep.mubr.msk.bf16.mxu0 %vm428_vm0, %v427_v0  ;;  %v61_v3 = vld [vmem:[#allocation2] sm:$0xff]  ;;  %v324_v4 = vld [vmem:[#allocation7 + $0x38] sm:$0xff]   ;;  %vm86_vm1 = vcmask 261120   ;;  %v325_v6 = vld [vmem:[#allocation7 + $0x30] sm:$0xff]  }
  0x27   :  { %294 = vmatprep.subr.bf16.mxu1 %v427_v0  ;;  %310 = vmatprep.mubr.msk.bf16.mxu1 %vm428_vm0, %v427_v0  ;;  %v62_v5 = vpack.c.bf16 %v61_v3, %v61_v3  ;;  %v326_v7 = vld [vmem:[#allocation7 + $0x28] sm:$0xff]   ;;  %v327_v8 = vld [vmem:[#allocation7 + $0x20] sm:$0xff]   ;;  %v328_v9 = vld [vmem:[#allocation7 + $0x18] sm:$0xff]  }
  0x28   :  { %287 = vmatpush3.bf16.msra.mxu0 %v322_v1  ;;  %295 = vmatpush3.bf16.msra.mxu1 %v324_v4  ;;  %v329_v10 = vld [vmem:[#allocation7 + $0x10] sm:$0xff]   ;;  %v330_v11 = vld [vmem:[#allocation7 + $0x8] sm:$0xff]   ;;  %v331_v12 = vld [vmem:[#allocation7] sm:$0xff]  }
  0x29   :  { %288 = vmatprep.subr.bf16.mxu0 %v427_v0  ;;  %296 = vmatprep.subr.bf16.mxu1 %v427_v0  ;;  %v261_v13 = vld [vmem:[%s480_s2] ss:$0 sm:$0xff]  ;;  %s429_s2 = smov [#allocation8]  }
  0x2a   :  { %v265_v21 = vld [vmem:[%s482_s4] ss:$0 sm:$0xff]  ;;  %s251_s11 = sshll.u32 %s429_s2, 4  ;;  %s252_s11 = int_to_ptr.vmem [resolvable:$true] %s251_s11 }
  0x2b   :  { %s396_s12 = scalar_lea.vmem %s252_s11, 128  ;;  %p401_p2 = scmp.lt.s32.totalorder %s252_s11, %s252_s11 }
  0x2c   :  { %289 = vmatpush3.bf16.msra.mxu0 %v323_v2  ;;  %297 = vmatpush3.bf16.msra.mxu1 %v325_v6  ;;  %p397_p1 = scmp.ne.s32.totalorder %s252_s11, %s396_s12  ;;  %p402_p3 = scmp.lt.s32.totalorder %s396_s12, %s396_s12 }
  0x2d   :  { %298 = vmatprep.subr.bf16.mxu1 %v427_v0 }
  0x2e   :  { %p403_p4 = por %p402_p3, %p401_p2 }
  0x2f   :  { %291 = vmatmul.mubr.msk.bf16.vlgmr.msra.gmra.mxu0 %vm86_vm1, %v62_v5 }
  0x30   :  { %299 = vmatpush3.bf16.msra.mxu1 %v326_v7  ;;  %p404_p5 = pnand %p403_p4, %p397_p1 }
  0x31   :  { %300 = vmatprep.subr.bf16.mxu1 %v427_v0 }
  0x34   :  { %301 = vmatpush3.bf16.msra.mxu1 %v327_v8 }
  0x35   :  { %302 = vmatprep.subr.bf16.mxu1 %v427_v0 }
  0x38   :  { %303 = vmatpush3.bf16.msra.mxu1 %v328_v9 }
  0x39   :  { %304 = vmatprep.subr.bf16.mxu1 %v427_v0 }
  0x3c   :  { %305 = vmatpush3.bf16.msra.mxu1 %v329_v10 }
  0x3d   :  { %306 = vmatprep.subr.bf16.mxu1 %v427_v0 }
  0x40   :  { %307 = vmatpush3.bf16.msra.mxu1 %v330_v11 }
  0x41   :  { %308 = vmatprep.subr.bf16.mxu1 %v427_v0 }
  0x44   :  { %309 = vmatpush3.bf16.msra.mxu1 %v331_v12 }
  0xef   :  { %v124_v14 = vpop.f32.mrf.mxu0 }
  0xf0   :  { %v125_v15 = vadd.f32 %v261_v13, %v124_v14 }
  0xf1   :  { %v292_v16 = vpop.f32.mrf.mxu0 }
  0xf2   :  { %332 = vtanh.f32 %v125_v15 }
  0xf3   :  { %v127_v17 = vpop.f32.mrf.mxu0 }
  0xf5   :  { %v293_v18 = vpop.f32.mrf.mxu0 }
  0xff   :  { %v333_v19 = vpop.eup %332 }
 0x100   :  { %v131_v20 = vpack.c.bf16 %v333_v19, %v333_v19 }
 0x102   :  { %311 = vmatmul.mubr.bf16.vlgmr.msra.gmra.mxu1 %v131_v20 }
 0x1c2   :  { %v237_v22 = vpop.f32.mrf.mxu1 }
 0x1c3   :  { %v238_v23 = vadd.f32 %v265_v21, %v237_v22 }
 0x1c4   :  { %v312_v24 = vpop.f32.mrf.mxu1 }
 0x1c5   :  { %334 = vtanh.f32 %v238_v23 }
 0x1c6   :  { %v240_v25 = vpop.f32.mrf.mxu1 }
 0x1c8   :  { %v313_v26 = vpop.f32.mrf.mxu1 }
 0x1d2   :  { %v335_v27 = vpop.eup %334 }
 0x1d3   :  { %244 = vst [vmem:[#allocation8] sm:$0xff] %v335_v27 }
 0x1d4   :  { %407 = shalt.err (!%p404_p5)
}
 0x1d5   :  { %254 = dma.vmem_to_hbm [thread:$0]  %s252_s11, 128, %s483_s5, [#allocation4]  }
 0x1d6   :  { %420 = dma.done.wait [#allocation4], 128  }
 0x1d7   :  { %421 = vsyncadd [#allocation4], 4294967168 }
 0x1d8   :  { %258 = vsyncpa [#allocation3], 1 }
 0x1d9   :  { %259 = vsyncpa [#allocation6], 1 }
 0x1da   :  { %260 = vsyncpa [#allocation4], 1 }

</bundles_post_ra>
